<compile_context>
chip_gen: v7x
topology: tpu7x:2x2x1
jax: 0.10.0
libtpu: 0.0.40
codegen_flags: <defaults>
</compile_context>

<pallas_src>
import functools

import jax
import jax.numpy as jnp
from jax.experimental import pallas as pl
from jax.experimental.pallas import tpu as pltpu

SUBLANE = 8
_SMALL_INPUT_BYTES = 1 << 20  # below this, fused XLA beats a pallas_call launch


def _ell_kernel(x_ref, o_ref, *, force_half_points: bool):
    x = x_ref[...].astype(jnp.float32)
    y = jax.nn.sigmoid(x) * 4.0 + 1.0
    if force_half_points:
        # torch.round is round-half-to-even; jnp.round matches.
        y = jnp.round(y * 2.0) * 0.5
    o_ref[...] = y.astype(o_ref.dtype)


def ell_activation_ref(x, force_half_points: bool = False):
    """Pure-JAX reference (also used as the small-input fast path)."""
    y = jax.nn.sigmoid(x.astype(jnp.float32)) * 4.0 + 1.0
    if force_half_points:
        y = jnp.round(y * 2.0) * 0.5
    return y.astype(x.dtype)


def ell_activation(x, force_half_points: bool = False, *,
                   block_rows: int = 512, force_pallas: bool = False):
    """Elementwise ELL activation. Accepts any shape; preserves shape/dtype."""
    orig_shape = x.shape
    orig_dtype = x.dtype
    n = x.size
    itemsize = jnp.dtype(orig_dtype).itemsize

    if n == 0:
        return x

    # Small-input fast path: launch overhead would dominate; let XLA fuse it.
    if not force_pallas and n * itemsize < _SMALL_INPUT_BYTES:
        return ell_activation_ref(x, force_half_points)

    # Pick the widest lane dimension (multiple of 128) that needs no padding.
    lane_width = None
    for cand in (1024, 512, 256, 128):
        if n % cand == 0:
            lane_width = cand
            break

    xf = jnp.ravel(x)
    padded = False
    if lane_width is None:
        # Minimal tail pad (< 128 elements) so the flat array reshapes cleanly.
        lane_width = 128
        n_pad = pl.cdiv(n, lane_width) * lane_width
        xf = jnp.concatenate(
            [xf, jnp.zeros((n_pad - n,), dtype=orig_dtype)])
        padded = True

    rows = xf.size // lane_width
    x2d = xf.reshape(rows, lane_width)

    # Row-block selection: multiple of SUBLANE (or full extent), ~2 MiB blocks.
    tr_cap = max(SUBLANE, (block_rows // SUBLANE) * SUBLANE)
    if rows <= tr_cap:
        tr = rows  # single block covering the full row extent (always legal)
    else:
        tr = tr_cap
    grid = pl.cdiv(rows, tr)

    # Keep >= 2 grid steps when there is enough data, so v7x's 2 TensorCores
    # (dimension_semantics="parallel") both stream. v5e/v6e are unaffected.
    if grid == 1 and rows >= 2 * SUBLANE:
        tr = max(SUBLANE, (((rows + 1) // 2) + SUBLANE - 1) // SUBLANE * SUBLANE)
        grid = pl.cdiv(rows, tr)

    kernel = functools.partial(_ell_kernel, force_half_points=force_half_points)
    out2d = pl.pallas_call(
        kernel,
        out_shape=jax.ShapeDtypeStruct((rows, lane_width), orig_dtype),
        grid_spec=pltpu.PrefetchScalarGridSpec(
            num_scalar_prefetch=0,
            grid=(grid,),
            in_specs=[pl.BlockSpec((tr, lane_width), lambda i: (i, 0))],
            out_specs=pl.BlockSpec((tr, lane_width), lambda i: (i, 0)),
        ),
        compiler_params=pltpu.CompilerParams(
            dimension_semantics=("parallel",),
        ),
        cost_estimate=pl.CostEstimate(
            flops=5 * n,
            transcendentals=n,
            bytes_accessed=2 * n * itemsize,
        ),
    )(x2d)

    if padded:
        out = out2d.reshape(-1)[:n].reshape(orig_shape)
    else:
        out = out2d.reshape(orig_shape)
    return out


if __name__ == "__main__":
    key = jax.random.PRNGKey(0)
    k1, k2, k3 = jax.random.split(key, 3)

    # Spec shape: NCHW [2, 4, 16, 16]. Force the Pallas path so the kernel runs.
    x = jax.random.normal(k1, (2, 4, 16, 16), dtype=jnp.float32) * 3.0

    y = ell_activation(x, force_half_points=False, force_pallas=True)
    jax.block_until_ready(y)
    assert y.shape == x.shape and y.dtype == x.dtype
    assert jnp.allclose(y, ell_activation_ref(x, False), atol=1e-5, rtol=1e-5)

    y2 = ell_activation(x, force_half_points=True, force_pallas=True)
    jax.block_until_ready(y2)
    assert jnp.allclose(y2, ell_activation_ref(x, True), atol=1e-5, rtol=1e-5)

    # Larger lane-aligned input: wide-lane (C=1024), multi-step cdiv grid.
    x_big = jax.random.normal(k2, (4, 64, 64, 64), dtype=jnp.float32) * 3.0
    yb = ell_activation(x_big, force_half_points=True)
    jax.block_until_ready(yb)
    assert jnp.allclose(yb, ell_activation_ref(x_big, True), atol=1e-5, rtol=1e-5)

    # Size not a multiple of 128: exercises minimal tail pad + masked last block.
    x_odd = jax.random.normal(k3, (2, 3, 100, 100), dtype=jnp.float32) * 3.0
    yo = ell_activation(x_odd, force_half_points=False, force_pallas=True)
    jax.block_until_ready(yo)
    assert jnp.allclose(yo, ell_activation_ref(x_odd, False), atol=1e-5, rtol=1e-5)

    print("KERNEL_OK")
</pallas_src>

<mosaic_0001>
module attributes {stable_mosaic.version = 11 : i64} {
  func.func @_ell_kernel(%arg0: i32, %arg1: memref<2x1024xf32, #tpu.memory_space<vmem>>, %arg2: memref<2x1024xf32, #tpu.memory_space<vmem>>) attributes {dimension_semantics = [#tpu.dimension_semantics<parallel>], iteration_bounds = array<i64: 1>, scalar_prefetch = 0 : i64, scratch_operands = 0 : i64, tpu.core_type = #tpu.core_type<tc>, window_params = [{transform_indices = @transform_0, window_bounds = array<i64: 2, 1024>}, {transform_indices = @transform_1, window_bounds = array<i64: 2, 1024>}]} {
    %c0 = arith.constant 0 : index
    %c0_0 = arith.constant 0 : index
    %0 = vector.load %arg1[%c0, %c0_0] : memref<2x1024xf32, #tpu.memory_space<vmem>>, vector<2x1024xf32>
    %1 = arith.negf %0 : vector<2x1024xf32>
    %2 = math.exp %1 : vector<2x1024xf32>
    %cst = arith.constant 1.000000e+00 : f32
    %3 = vector.broadcast %cst : f32 to vector<2x1024xf32>
    %4 = arith.addf %3, %2 : vector<2x1024xf32>
    %5 = arith.divf %3, %4 : vector<2x1024xf32>
    %cst_1 = arith.constant 4.000000e+00 : f32
    %6 = vector.broadcast %cst_1 : f32 to vector<2x1024xf32>
    %7 = arith.mulf %5, %6 : vector<2x1024xf32>
    %cst_2 = arith.constant 1.000000e+00 : f32
    %8 = vector.broadcast %cst_2 : f32 to vector<2x1024xf32>
    %9 = arith.addf %7, %8 : vector<2x1024xf32>
    %c0_3 = arith.constant 0 : index
    %c0_4 = arith.constant 0 : index
    %10 = vector.load %arg2[%c0_3, %c0_4] : memref<2x1024xf32, #tpu.memory_space<vmem>>, vector<2x1024xf32>
    tpu.vector_store %arg2[%c0_3, %c0_4], %9 {strides = array<i32>} : memref<2x1024xf32, #tpu.memory_space<vmem>>, vector<2x1024xf32>,
    return
  }
  func.func @transform_0(%arg0: i32) -> (i32, i32) {
    %c0_i32 = arith.constant 0 : i32
    %c0_i32_0 = arith.constant 0 : i32
    return %arg0, %c0_i32 : i32, i32
  }
  func.func @transform_1(%arg0: i32) -> (i32, i32) {
    %c0_i32 = arith.constant 0 : i32
    %c0_i32_0 = arith.constant 0 : i32
    return %arg0, %c0_i32 : i32, i32
  }
}

</mosaic_0001>

<bundles_post_ra>
// kernel: tpu_custom_call.1
= control target key start
LH: loop header
LB: loop body
LE: loop exit
PB: predicated region body
PF: predicated region fallthrough
CT: control target
= control target key end

     0   :  { %6 = vsyncpa [#allocation3], 0  ;;  %s152_s0 = inlined_call_operand.hbm [shape: f32[2,1024], index: 0, kind: input, shape index: {}]   ;;  %s153_s1 = inlined_call_operand.hbm [shape: f32[2,1024], index: 1, kind: output, shape index: {}]  }
   0x1   :  { %7 = vsyncpa [#allocation4], 0  ;;  %s116_s6 = smov [#allocation2]   ;;  %s68_s10 = scalar_lea.hbm %s152_s0, 256 }
   0x2   :  { %s14_s7 = sshll.u32 %s116_s6, 4  ;;  %p69_p0 = scmp.ne.s32.totalorder %s152_s0, %s68_s10  ;;  %s15_s7 = int_to_ptr.vmem [resolvable:$true] %s14_s7 }
   0x3   :  { %p72_p1 = scmp.lt.u32.totalorder %s68_s10, %s152_s0 }
   0x5   :  { %p74_p2 = pnand %p72_p1, %p69_p0 }
   0x7   :  { %77 = shalt.err (!%p74_p2)
}
   0x8   :  { %s78_s15 = scalar_lea.vmem %s15_s7, 256  ;;  %p83_p4 = scmp.lt.s32.totalorder %s15_s7, %s15_s7 }
   0x9   :  { %p79_p3 = scmp.ne.s32.totalorder %s15_s7, %s78_s15  ;;  %p84_p5 = scmp.lt.s32.totalorder %s78_s15, %s78_s15 }
   0xb   :  { %p85_p6 = por %p84_p5, %p83_p4 }
   0xd   :  { %p86_p7 = pnand %p85_p6, %p79_p3 }
   0xf   :  { %89 = shalt.err (!%p86_p7)
}
  0x10   :  { %17 = dma.hbm_to_vmem [thread:$0]  %s152_s0, 256, %s15_s7, [#allocation3]  }
  0x11   :  { %112 = dma.done.wait [#allocation3], 256  }
  0x12   :  { %113 = vsyncadd [#allocation3], 4294967040  ;;  %v21_v0 = vld [vmem:[#allocation2] sm:$0xff]  ;;  %v22_v1 = vld [vmem:[#allocation2 + $0x8] sm:$0xff]  ;;  %s117_s18 = smov [#allocation5]  }
  0x13   :  { %v56_v2 = vmul.f32 -1.442695, %v21_v0  ;;  %v57_v3 = vmul.f32 -1.442695, %v22_v1  ;;  %s47_s19 = sshll.u32 %s117_s18, 4  ;;  %s48_s19 = int_to_ptr.vmem [resolvable:$true] %s47_s19 }
  0x14   :  { %s90_s0 = scalar_lea.vmem %s48_s19, 256  ;;  %p95_p9 = scmp.lt.s32.totalorder %s48_s19, %s48_s19 }
  0x15   :  { %60 = vpow2.f32 %v56_v2  ;;  %p91_p8 = scmp.ne.s32.totalorder %s48_s19, %s90_s0  ;;  %p96_p10 = scmp.lt.s32.totalorder %s90_s0, %s90_s0 }
  0x16   :  { %62 = vpow2.f32 %v57_v3 }
  0x17   :  { %p97_p11 = por %p96_p10, %p95_p9 }
  0x19   :  { %p98_p12 = pnand %p97_p11, %p91_p8 }
  0x1f   :  { %v61_v4 = vpop.eup %60 }
  0x20   :  { %v63_v5 = vpop.eup %62  ;;  %v29_v6 = vadd.f32 1.0, %v61_v4 }
  0x21   :  { %v30_v7 = vadd.f32 1.0, %v63_v5 }
  0x22   :  { %64 = vrcp.f32 %v29_v6 }
  0x23   :  { %66 = vrcp.f32 %v30_v7 }
  0x2c   :  { %v65_v8 = vpop.eup %64 }
  0x2d   :  { %v67_v9 = vpop.eup %66  ;;  %v35_v10 = vmul.f32 4.0, %v65_v8 }
  0x2e   :  { %v36_v11 = vmul.f32 4.0, %v67_v9 }
  0x2f   :  { %v37_v12 = vadd.f32 1.0, %v35_v10 }
  0x30   :  { %v38_v13 = vadd.f32 1.0, %v36_v11 }
  0x31   :  { %39 = vst [vmem:[#allocation5] sm:$0xff] %v37_v12 }
  0x32   :  { %40 = vst [vmem:[#allocation5 + $0x8] sm:$0xff] %v38_v13 }
  0x33   :  { %101 = shalt.err (!%p98_p12)
}
  0x34   :  { %s102_s22 = scalar_lea.hbm %s153_s1, 256 }
  0x35   :  { %p103_p13 = scmp.ne.s32.totalorder %s153_s1, %s102_s22  ;;  %p106_p0 = scmp.lt.u32.totalorder %s102_s22, %s153_s1 }
  0x37   :  { %p108_p1 = pnand %p106_p0, %p103_p13 }
  0x39   :  { %111 = shalt.err (!%p108_p1)
}
  0x3a   :  { %50 = dma.vmem_to_hbm [thread:$0]  %s48_s19, 256, %s153_s1, [#allocation4]  }
  0x3b   :  { %114 = dma.done.wait [#allocation4], 256  }
  0x3c   :  { %115 = vsyncadd [#allocation4], 4294967040 }
  0x3d   :  { %54 = vsyncpa [#allocation3], 1 }
  0x3e   :  { %55 = vsyncpa [#allocation4], 1 }

</bundles_post_ra>
